<compile_context>
chip_gen: v5e
topology: v5e:2x2
jax: 0.10.0
libtpu: 0.0.40
codegen_flags: <defaults>
</compile_context>

<pallas_src>
import jax
import jax.numpy as jnp
from jax import lax
from jax.experimental import pallas as pl
from jax.experimental.pallas import tpu as pltpu

KH = KW = 3  # 3x3 conv, padding=1 ("same")


# ---------------------------------------------------------------------------
# Pallas kernel: fused 3x3 conv (one K=36 matmul) + bias + ReLU, whole batch
# ---------------------------------------------------------------------------
def _make_conv3x3_relu_kernel(B, C_in, C_out, H, W):
    HW = H * W

    def kernel(x_ref, w_ref, b_ref, m_ref, o_ref):
        # x_ref: (B, C_in, L)            bf16  H-padded, flattened, flat-padded by 1
        # w_ref: (C_out, 9*C_in)         bf16  packed taps, column index = t*C_in + c
        # b_ref: (C_out, 1)              f32
        # m_ref: (2, B*HW)               bf16  row 0: zeros at w==0; row 1: zeros at w==W-1
        # o_ref: (B, C_out, HW)          f32   lane-dense output (HW = 256)
        mask_l = m_ref[0:1, :]                                   # (1, B*HW), loaded once
        mask_r = m_ref[1:2, :]

        # Build the (9*C_in, B*HW) bf16 patch from 9 static lane slices per image.
        rows = []
        for kh in range(KH):
            for kw in range(KW):
                s = kh * W + kw                                  # static lane offset of this tap
                xs = jnp.concatenate(
                    [x_ref[b, :, pl.ds(s, HW)] for b in range(B)],
                    axis=-1)                                     # (C_in, B*HW) bf16
                # Re-impose the W zero-padding on the *input* slice (cheap, bf16,
                # and required since taps are summed inside the MXU).
                if kw == 0:
                    xs = xs * mask_l
                elif kw == KW - 1:
                    xs = xs * mask_r
                rows.append(xs)
        patch = jnp.concatenate(rows, axis=0)                    # (9*C_in, B*HW) bf16

        # One MXU push: (C_out, 9*C_in) @ (9*C_in, B*HW) -> f32.
        y = jnp.dot(w_ref[...], patch, preferred_element_type=jnp.float32)
        y = jnp.maximum(y + b_ref[...], 0.0)                     # bias + ReLU (VPU, f32)

        # Write the per-image 256-lane halves back (static slices, channel-major).
        for b in range(B):
            o_ref[b] = y[:, b * HW:(b + 1) * HW]

    return kernel


def _conv3x3_relu_pallas(x_flat, w_packed, bias, masks, *, C_out, H, W):
    """x_flat: (B, C_in, L) bf16, w_packed: (C_out, 9*C_in) bf16,
    bias: (C_out, 1) f32, masks: (2, B*H*W) bf16  ->  (B, C_out, H*W) f32."""
    B, C_in, L = x_flat.shape
    HW = H * W
    kernel = _make_conv3x3_relu_kernel(B, C_in, C_out, H, W)

    cost = pl.CostEstimate(
        flops=2 * B * C_out * HW * (KH * KW * C_in),
        transcendentals=0,
        bytes_accessed=(x_flat.size * 2 + w_packed.size * 2 + bias.size * 4
                        + masks.size * 2 + B * C_out * HW * 4),
    )

    return pl.pallas_call(
        kernel,
        out_shape=jax.ShapeDtypeStruct((B, C_out, HW), jnp.float32),
        grid_spec=pltpu.PrefetchScalarGridSpec(
            num_scalar_prefetch=0,
            # Single grid step: the whole (tiny) batch is one MXU push, so extra
            # grid steps would only add per-step pipeline overhead.  All block
            # dims equal the full array dims -> no (8,128) divisibility asserts.
            grid=(1,),
            in_specs=[
                pl.BlockSpec((B, C_in, L), lambda i: (0, 0, 0)),             # image slab
                pl.BlockSpec((C_out, KH * KW * C_in), lambda i: (0, 0)),     # packed weights
                pl.BlockSpec((C_out, 1), lambda i: (0, 0)),                  # bias
                pl.BlockSpec((2, B * HW), lambda i: (0, 0)),                 # column masks
            ],
            out_specs=pl.BlockSpec((B, C_out, HW), lambda i: (0, 0, 0)),     # lane-dense output
        ),
        compiler_params=pltpu.CompilerParams(
            dimension_semantics=("arbitrary",),
            # Tiny footprint (<100 KiB); explicit cap stays well inside every
            # generation's VMEM, including v7x's 64 MiB physical.
            vmem_limit_bytes=16 * 1024 * 1024,
        ),
        cost_estimate=cost,
    )(x_flat, w_packed, bias, masks)


# ---------------------------------------------------------------------------
# Encoder wrapper (layout plumbing only, in plain JAX)
# ---------------------------------------------------------------------------
def encoder_forward(image, conv_w, conv_b):
    """image: (B, C_in, H, W) NCHW f32 -> (B, C_out*H*W) f32, matching
    PyTorch `x = encoder(image); x.view(batch, -1)` (up to bf16 input cast)."""
    B, C_in, H, W = image.shape
    C_out = conv_w.shape[0]
    HW = H * W

    # bf16 inputs halve the dominant DMA traffic; accumulation stays f32 in-kernel.
    x_b = image.astype(jnp.bfloat16)
    # Pad H by 1 row each side, flatten (H+2, W) -> (H+2)*W, pad the flat axis by
    # 1 each side.  Tap (kh, kw) is then the contiguous lane slice at kh*W+kw.
    x_h = jnp.pad(x_b, ((0, 0), (0, 0), (1, 1), (0, 0)))               # (B, C_in, H+2, W)
    x_flat = jnp.pad(x_h.reshape(B, C_in, (H + 2) * W),
                     ((0, 0), (0, 0), (1, 1)))                         # (B, C_in, (H+2)*W + 2)

    # Weights packed for the fused K=36 matmul: column t*C_in + c = conv_w[o, c, kh, kw].
    w_packed = jnp.transpose(conv_w, (0, 2, 3, 1)).reshape(C_out, KH * KW * C_in)
    w_packed = w_packed.astype(jnp.bfloat16)
    bias = conv_b.reshape(C_out, 1).astype(jnp.float32)

    # Column masks restoring the W zero-padding for the kw=0 / kw=2 taps,
    # tiled across the batch-stacked lane axis, bf16 (applied to bf16 inputs).
    col = jnp.arange(HW, dtype=jnp.int32) % W
    masks_one = jnp.stack([(col != 0), (col != W - 1)], axis=0).astype(jnp.bfloat16)  # (2, HW)
    masks = jnp.tile(masks_one, (1, B))                                               # (2, B*HW)

    out = _conv3x3_relu_pallas(x_flat, w_packed, bias, masks, C_out=C_out, H=H, W=W)
    # out is already (B, C_out, H*W): channel-major, so PyTorch's .view(B, -1)
    # is a free reshape — no post-kernel transpose.
    return out.reshape(B, -1)


# ---------------------------------------------------------------------------
# Reference (pure JAX) for verification — same bf16-cast inputs, f32 math.
# ---------------------------------------------------------------------------
def encoder_forward_ref(image, conv_w, conv_b):
    x = image.astype(jnp.bfloat16).astype(jnp.float32)
    w = conv_w.astype(jnp.bfloat16).astype(jnp.float32)
    y = lax.conv_general_dilated(
        x, w,
        window_strides=(1, 1),
        padding=((1, 1), (1, 1)),
        dimension_numbers=("NCHW", "OIHW", "NCHW"),
        precision=lax.Precision.HIGHEST,
    )
    y = jnp.maximum(y + conv_b.reshape(1, -1, 1, 1), 0.0)
    return y.reshape(image.shape[0], -1)


if __name__ == "__main__":
    B, C_in, H, W = 2, 4, 16, 16
    C_out = 8

    key = jax.random.PRNGKey(0)
    k_img, k_w, k_b = jax.random.split(key, 3)

    image = jax.random.normal(k_img, (B, C_in, H, W), dtype=jnp.float32)
    conv_w = 0.1 * jax.random.normal(k_w, (C_out, C_in, 3, 3), dtype=jnp.float32)
    conv_b = 0.1 * jax.random.normal(k_b, (C_out,), dtype=jnp.float32)

    out = jax.block_until_ready(encoder_forward(image, conv_w, conv_b))
    ref = encoder_forward_ref(image, conv_w, conv_b)

    assert out.shape == (B, C_out * H * W), out.shape
    assert jnp.allclose(out, ref, atol=1e-4, rtol=1e-4), float(jnp.max(jnp.abs(out - ref)))

    print("KERNEL_OK")
</pallas_src>

<mosaic_0001>
module attributes {stable_mosaic.version = 11 : i64} {
  func.func @kernel(%arg0: i32, %arg1: memref<2x4x290xbf16, #tpu.memory_space<vmem>>, %arg2: memref<8x36xbf16, #tpu.memory_space<vmem>>, %arg3: memref<8x1xf32, #tpu.memory_space<vmem>>, %arg4: memref<2x512xbf16, #tpu.memory_space<vmem>>, %arg5: memref<2x8x256xf32, #tpu.memory_space<vmem>>) attributes {dimension_semantics = [#tpu.dimension_semantics<arbitrary>], iteration_bounds = array<i64: 1>, scalar_prefetch = 0 : i64, scratch_operands = 0 : i64, tpu.core_type = #tpu.core_type<tc>, window_params = [{pipeline_mode = #tpu.pipeline_mode<synchronous>, transform_indices = @transform_0, window_bounds = array<i64: 2, 4, 290>}, {pipeline_mode = #tpu.pipeline_mode<synchronous>, transform_indices = @transform_1, window_bounds = array<i64: 8, 36>}, {pipeline_mode = #tpu.pipeline_mode<synchronous>, transform_indices = @transform_2, window_bounds = array<i64: 8, 1>}, {pipeline_mode = #tpu.pipeline_mode<synchronous>, transform_indices = @transform_3, window_bounds = array<i64: 2, 512>}, {pipeline_mode = #tpu.pipeline_mode<synchronous>, transform_indices = @transform_4, window_bounds = array<i64: 2, 8, 256>}]} {
    %c0 = arith.constant 0 : index
    %c0_0 = arith.constant 0 : index
    %0 = vector.load %arg4[%c0, %c0_0] : memref<2x512xbf16, #tpu.memory_space<vmem>>, vector<1x512xbf16>
    %c1 = arith.constant 1 : index
    %c0_1 = arith.constant 0 : index
    %1 = vector.load %arg4[%c1, %c0_1] : memref<2x512xbf16, #tpu.memory_space<vmem>>, vector<1x512xbf16>
    %c0_2 = arith.constant 0 : index
    %c0_3 = arith.constant 0 : index
    %c0_4 = arith.constant 0 : index
    %2 = vector.load %arg1[%c0_2, %c0_3, %c0_4] : memref<2x4x290xbf16, #tpu.memory_space<vmem>>, vector<1x4x256xbf16>
    %3 = vector.shape_cast %2 : vector<1x4x256xbf16> to vector<4x256xbf16>
    %c1_5 = arith.constant 1 : index
    %c0_6 = arith.constant 0 : index
    %c0_7 = arith.constant 0 : index
    %4 = vector.load %arg1[%c1_5, %c0_6, %c0_7] : memref<2x4x290xbf16, #tpu.memory_space<vmem>>, vector<1x4x256xbf16>
    %5 = vector.shape_cast %4 : vector<1x4x256xbf16> to vector<4x256xbf16>
    %6 = tpu.concatenate %3, %5 in 1 : vector<4x256xbf16>, vector<4x256xbf16> -> vector<4x512xbf16>
    %7 = vector.broadcast %0 : vector<1x512xbf16> to vector<4x512xbf16>
    %8 = arith.mulf %6, %7 : vector<4x512xbf16>
    %c0_8 = arith.constant 0 : index
    %c0_9 = arith.constant 0 : index
    %c1_10 = arith.constant 1 : index
    %9 = vector.load %arg1[%c0_8, %c0_9, %c1_10] : memref<2x4x290xbf16, #tpu.memory_space<vmem>>, vector<1x4x256xbf16>
    %10 = vector.shape_cast %9 : vector<1x4x256xbf16> to vector<4x256xbf16>
    %c1_11 = arith.constant 1 : index
    %c0_12 = arith.constant 0 : index
    %c1_13 = arith.constant 1 : index
    %11 = vector.load %arg1[%c1_11, %c0_12, %c1_13] : memref<2x4x290xbf16, #tpu.memory_space<vmem>>, vector<1x4x256xbf16>
    %12 = vector.shape_cast %11 : vector<1x4x256xbf16> to vector<4x256xbf16>
    %13 = tpu.concatenate %10, %12 in 1 : vector<4x256xbf16>, vector<4x256xbf16> -> vector<4x512xbf16>
    %c0_14 = arith.constant 0 : index
    %c0_15 = arith.constant 0 : index
    %c2 = arith.constant 2 : index
    %14 = vector.load %arg1[%c0_14, %c0_15, %c2] : memref<2x4x290xbf16, #tpu.memory_space<vmem>>, vector<1x4x256xbf16>
    %15 = vector.shape_cast %14 : vector<1x4x256xbf16> to vector<4x256xbf16>
    %c1_16 = arith.constant 1 : index
    %c0_17 = arith.constant 0 : index
    %c2_18 = arith.constant 2 : index
    %16 = vector.load %arg1[%c1_16, %c0_17, %c2_18] : memref<2x4x290xbf16, #tpu.memory_space<vmem>>, vector<1x4x256xbf16>
    %17 = vector.shape_cast %16 : vector<1x4x256xbf16> to vector<4x256xbf16>
    %18 = tpu.concatenate %15, %17 in 1 : vector<4x256xbf16>, vector<4x256xbf16> -> vector<4x512xbf16>
    %19 = vector.broadcast %1 : vector<1x512xbf16> to vector<4x512xbf16>
    %20 = arith.mulf %18, %19 : vector<4x512xbf16>
    %c0_19 = arith.constant 0 : index
    %c0_20 = arith.constant 0 : index
    %c16 = arith.constant 16 : index
    %21 = vector.load %arg1[%c0_19, %c0_20, %c16] : memref<2x4x290xbf16, #tpu.memory_space<vmem>>, vector<1x4x256xbf16>
    %22 = vector.shape_cast %21 : vector<1x4x256xbf16> to vector<4x256xbf16>
    %c1_21 = arith.constant 1 : index
    %c0_22 = arith.constant 0 : index
    %c16_23 = arith.constant 16 : index
    %23 = vector.load %arg1[%c1_21, %c0_22, %c16_23] : memref<2x4x290xbf16, #tpu.memory_space<vmem>>, vector<1x4x256xbf16>
    %24 = vector.shape_cast %23 : vector<1x4x256xbf16> to vector<4x256xbf16>
    %25 = tpu.concatenate %22, %24 in 1 : vector<4x256xbf16>, vector<4x256xbf16> -> vector<4x512xbf16>
    %26 = vector.broadcast %0 : vector<1x512xbf16> to vector<4x512xbf16>
    %27 = arith.mulf %25, %26 : vector<4x512xbf16>
    %c0_24 = arith.constant 0 : index
    %c0_25 = arith.constant 0 : index
    %c17 = arith.constant 17 : index
    %28 = vector.load %arg1[%c0_24, %c0_25, %c17] : memref<2x4x290xbf16, #tpu.memory_space<vmem>>, vector<1x4x256xbf16>
    %29 = vector.shape_cast %28 : vector<1x4x256xbf16> to vector<4x256xbf16>
    %c1_26 = arith.constant 1 : index
    %c0_27 = arith.constant 0 : index
    %c17_28 = arith.constant 17 : index
    %30 = vector.load %arg1[%c1_26, %c0_27, %c17_28] : memref<2x4x290xbf16, #tpu.memory_space<vmem>>, vector<1x4x256xbf16>
    %31 = vector.shape_cast %30 : vector<1x4x256xbf16> to vector<4x256xbf16>
    %32 = tpu.concatenate %29, %31 in 1 : vector<4x256xbf16>, vector<4x256xbf16> -> vector<4x512xbf16>
    %c0_29 = arith.constant 0 : index
    %c0_30 = arith.constant 0 : index
    %c18 = arith.constant 18 : index
    %33 = vector.load %arg1[%c0_29, %c0_30, %c18] : memref<2x4x290xbf16, #tpu.memory_space<vmem>>, vector<1x4x256xbf16>
    %34 = vector.shape_cast %33 : vector<1x4x256xbf16> to vector<4x256xbf16>
    %c1_31 = arith.constant 1 : index
    %c0_32 = arith.constant 0 : index
    %c18_33 = arith.constant 18 : index
    %35 = vector.load %arg1[%c1_31, %c0_32, %c18_33] : memref<2x4x290xbf16, #tpu.memory_space<vmem>>, vector<1x4x256xbf16>
    %36 = vector.shape_cast %35 : vector<1x4x256xbf16> to vector<4x256xbf16>
    %37 = tpu.concatenate %34, %36 in 1 : vector<4x256xbf16>, vector<4x256xbf16> -> vector<4x512xbf16>
    %38 = vector.broadcast %1 : vector<1x512xbf16> to vector<4x512xbf16>
    %39 = arith.mulf %37, %38 : vector<4x512xbf16>
    %c0_34 = arith.constant 0 : index
    %c0_35 = arith.constant 0 : index
    %c32 = arith.constant 32 : index
    %40 = vector.load %arg1[%c0_34, %c0_35, %c32] : memref<2x4x290xbf16, #tpu.memory_space<vmem>>, vector<1x4x256xbf16>
    %41 = vector.shape_cast %40 : vector<1x4x256xbf16> to vector<4x256xbf16>
    %c1_36 = arith.constant 1 : index
    %c0_37 = arith.constant 0 : index
    %c32_38 = arith.constant 32 : index
    %42 = vector.load %arg1[%c1_36, %c0_37, %c32_38] : memref<2x4x290xbf16, #tpu.memory_space<vmem>>, vector<1x4x256xbf16>
    %43 = vector.shape_cast %42 : vector<1x4x256xbf16> to vector<4x256xbf16>
    %44 = tpu.concatenate %41, %43 in 1 : vector<4x256xbf16>, vector<4x256xbf16> -> vector<4x512xbf16>
    %45 = vector.broadcast %0 : vector<1x512xbf16> to vector<4x512xbf16>
    %46 = arith.mulf %44, %45 : vector<4x512xbf16>
    %c0_39 = arith.constant 0 : index
    %c0_40 = arith.constant 0 : index
    %c33 = arith.constant 33 : index
    %47 = vector.load %arg1[%c0_39, %c0_40, %c33] : memref<2x4x290xbf16, #tpu.memory_space<vmem>>, vector<1x4x256xbf16>
    %48 = vector.shape_cast %47 : vector<1x4x256xbf16> to vector<4x256xbf16>
    %c1_41 = arith.constant 1 : index
    %c0_42 = arith.constant 0 : index
    %c33_43 = arith.constant 33 : index
    %49 = vector.load %arg1[%c1_41, %c0_42, %c33_43] : memref<2x4x290xbf16, #tpu.memory_space<vmem>>, vector<1x4x256xbf16>
    %50 = vector.shape_cast %49 : vector<1x4x256xbf16> to vector<4x256xbf16>
    %51 = tpu.concatenate %48, %50 in 1 : vector<4x256xbf16>, vector<4x256xbf16> -> vector<4x512xbf16>
    %c0_44 = arith.constant 0 : index
    %c0_45 = arith.constant 0 : index
    %c34 = arith.constant 34 : index
    %52 = vector.load %arg1[%c0_44, %c0_45, %c34] : memref<2x4x290xbf16, #tpu.memory_space<vmem>>, vector<1x4x256xbf16>
    %53 = vector.shape_cast %52 : vector<1x4x256xbf16> to vector<4x256xbf16>
    %c1_46 = arith.constant 1 : index
    %c0_47 = arith.constant 0 : index
    %c34_48 = arith.constant 34 : index
    %54 = vector.load %arg1[%c1_46, %c0_47, %c34_48] : memref<2x4x290xbf16, #tpu.memory_space<vmem>>, vector<1x4x256xbf16>
    %55 = vector.shape_cast %54 : vector<1x4x256xbf16> to vector<4x256xbf16>
    %56 = tpu.concatenate %53, %55 in 1 : vector<4x256xbf16>, vector<4x256xbf16> -> vector<4x512xbf16>
    %57 = vector.broadcast %1 : vector<1x512xbf16> to vector<4x512xbf16>
    %58 = arith.mulf %56, %57 : vector<4x512xbf16>
    %59 = tpu.concatenate %8, %13, %20, %27, %32, %39, %46, %51, %58 in 0 : vector<4x512xbf16>, vector<4x512xbf16>, vector<4x512xbf16>, vector<4x512xbf16>, vector<4x512xbf16>, vector<4x512xbf16>, vector<4x512xbf16>, vector<4x512xbf16>, vector<4x512xbf16> -> vector<36x512xbf16>
    %c0_49 = arith.constant 0 : index
    %c0_50 = arith.constant 0 : index
    %60 = vector.load %arg2[%c0_49, %c0_50] : memref<8x36xbf16, #tpu.memory_space<vmem>>, vector<8x36xbf16>
    %cst = arith.constant dense<0.000000e+00> : vector<8x512xf32>
    %61 = tpu.matmul %60, %59, %cst {dimension_numbers = #tpu.dot_dimension_numbers<[1], [0], [0], [1], [0, 0, 1, 1], [], []>} : vector<8x36xbf16>, vector<36x512xbf16>, vector<8x512xf32> -> vector<8x512xf32>
    %c0_51 = arith.constant 0 : index
    %c0_52 = arith.constant 0 : index
    %62 = vector.load %arg3[%c0_51, %c0_52] : memref<8x1xf32, #tpu.memory_space<vmem>>, vector<8x1xf32>
    %63 = vector.broadcast %62 : vector<8x1xf32> to vector<8x512xf32>
    %64 = arith.addf %61, %63 : vector<8x512xf32>
    %cst_53 = arith.constant 0.000000e+00 : f32
    %65 = vector.broadcast %cst_53 : f32 to vector<8x512xf32>
    %66 = arith.maximumf %64, %65 : vector<8x512xf32>
    %67 = vector.extract_strided_slice %66 {offsets = [0, 0], sizes = [8, 256], strides = [1, 1]} : vector<8x512xf32> to vector<8x256xf32>
    %c0_54 = arith.constant 0 : index
    %c0_55 = arith.constant 0 : index
    %c0_56 = arith.constant 0 : index
    %68 = vector.load %arg5[%c0_54, %c0_55, %c0_56] : memref<2x8x256xf32, #tpu.memory_space<vmem>>, vector<1x8x256xf32>
    %69 = vector.shape_cast %68 : vector<1x8x256xf32> to vector<8x256xf32>
    %70 = vector.shape_cast %67 : vector<8x256xf32> to vector<1x8x256xf32>
    tpu.vector_store %arg5[%c0_54, %c0_55, %c0_56], %70 {strides = array<i32>} : memref<2x8x256xf32, #tpu.memory_space<vmem>>, vector<1x8x256xf32>,
    %71 = vector.extract_strided_slice %66 {offsets = [0, 256], sizes = [8, 256], strides = [1, 1]} : vector<8x512xf32> to vector<8x256xf32>
    %c1_57 = arith.constant 1 : index
    %c0_58 = arith.constant 0 : index
    %c0_59 = arith.constant 0 : index
    %72 = vector.load %arg5[%c1_57, %c0_58, %c0_59] : memref<2x8x256xf32, #tpu.memory_space<vmem>>, vector<1x8x256xf32>
    %73 = vector.shape_cast %72 : vector<1x8x256xf32> to vector<8x256xf32>
    %74 = vector.shape_cast %71 : vector<8x256xf32> to vector<1x8x256xf32>
    tpu.vector_store %arg5[%c1_57, %c0_58, %c0_59], %74 {strides = array<i32>} : memref<2x8x256xf32, #tpu.memory_space<vmem>>, vector<1x8x256xf32>,
    return
  }
  func.func @transform_0(%arg0: i32) -> (i32, i32, i32) {
    %c0_i32 = arith.constant 0 : i32
    %c0_i32_0 = arith.constant 0 : i32
    %c0_i32_1 = arith.constant 0 : i32
    %c0_i32_2 = arith.constant 0 : i32
    return %c0_i32, %c0_i32_0, %c0_i32_1 : i32, i32, i32
  }
  func.func @transform_1(%arg0: i32) -> (i32, i32) {
    %c0_i32 = arith.constant 0 : i32
    %c0_i32_0 = arith.constant 0 : i32
    %c0_i32_1 = arith.constant 0 : i32
    return %c0_i32, %c0_i32_0 : i32, i32
  }
  func.func @transform_2(%arg0: i32) -> (i32, i32) {
    %c0_i32 = arith.constant 0 : i32
    %c0_i32_0 = arith.constant 0 : i32
    %c0_i32_1 = arith.constant 0 : i32
    return %c0_i32, %c0_i32_0 : i32, i32
  }
  func.func @transform_3(%arg0: i32) -> (i32, i32) {
    %c0_i32 = arith.constant 0 : i32
    %c0_i32_0 = arith.constant 0 : i32
    %c0_i32_1 = arith.constant 0 : i32
    return %c0_i32, %c0_i32_0 : i32, i32
  }
  func.func @transform_4(%arg0: i32) -> (i32, i32, i32) {
    %c0_i32 = arith.constant 0 : i32
    %c0_i32_0 = arith.constant 0 : i32
    %c0_i32_1 = arith.constant 0 : i32
    %c0_i32_2 = arith.constant 0 : i32
    return %c0_i32, %c0_i32_0, %c0_i32_1 : i32, i32, i32
  }
}

</mosaic_0001>

<bundles_post_ra>
// kernel: tpu_custom_call.1
= control target key start
LH: loop header
LB: loop body
LE: loop exit
PB: predicated region body
PF: predicated region fallthrough
CT: control target
= control target key end

     0   :  { %9 = vsyncpa [#allocation3], 0  ;;  %s1064_s0 = inlined_call_operand.hbm [shape: bf16[2,4,290], index: 0, kind: input, shape index: {}]   ;;  %s1065_s1 = inlined_call_operand.vmem [shape: bf16[8,36], index: 1, kind: input, shape index: {}]   ;;  %s1066_s2 = inlined_call_operand.vmem [shape: f32[8,1], index: 2, kind: input, shape index: {}]   ;;  %s1067_s3 = inlined_call_operand.vmem [shape: bf16[2,512], index: 3, kind: input, shape index: {}]   ;;  %s1068_s4 = inlined_call_operand.hbm [shape: f32[2,8,256], index: 4, kind: output, shape index: {}]  }
   0x1   :  { %10 = vsyncpa [#allocation4], 0  ;;  %s15_s17 = sshll.u32 %s1064_s0, 4  ;;  %s775_s18 = smov [#allocation2]   ;;  %s16_s17 = int_to_ptr.hbm [resolvable:$true] %s15_s17 }
   0x2   :  { %s17_s19 = sshll.u32 %s775_s18, 4  ;;  %s776_s20 = smov 96   ;;  %s18_s19 = int_to_ptr.vmem [resolvable:$true] %s17_s19 }
   0x3   :  { %s777_s21 = smov 6  }
   0x4   :  { %23 = dma.hbm_to_vmem [thread:$0]  %s16_s17, 192, %s18_s19, [#allocation3], %s776_s20, %s776_s20, %s777_s21  }
   0x5   :  { %771 = dma.done.wait [#allocation3], 192  }
   0x6   :  { %772 = vsyncadd [#allocation3], 4294967104  ;;  %v36_v0 = vld [vmem:[#allocation2] sm:$0xf]  ;;  %v38_v1 = vld [vmem:[#allocation2 + $0x6] sm:$0xf] }
   0x7   :  { %40 = vst [vmem:[#allocation1] ss:$4 sm:$0xff] %v36_v0  ;;  %v35_v4 = vld [vmem:[%s1067_s3] sm:$0xf]  ;;  %v83_v7 = vld [vmem:[#allocation2] sm:$0x3f] }
   0x8   :  { %v84_v12 = vld [vmem:[#allocation2 + $0x6] sm:$0x3f]  ;;  %v118_v16 = vld [vmem:[#allocation2] sm:$0x3f]  ;;  %s778_s3 = smov 127   ;;  %s779_s23 = smov 126  }
   0x9   :  { %v119_v20 = vld [vmem:[#allocation2 + $0x6] sm:$0x3f]  ;;  %v192_v27 = vld [vmem:[#allocation2] sm:$0x3f]  ;;  %s780_s24 = smov 112   ;;  %s781_s25 = smov 111  }
   0xa   :  { %v193_v32 = vld [vmem:[#allocation2 + $0x6] sm:$0x3f]  ;;  %v241_v36 = vld [vmem:[#allocation2] sm:$0x3f]  ;;  %s782_s26 = smov 110   ;;  %vm99_vm0 = vcmask 1039360  }
   0xb   :  { %v242_v40 = vld [vmem:[#allocation2 + $0x6] sm:$0x3f]  ;;  %v276_v44 = vld [vmem:[#allocation2] sm:$0x3f]  ;;  %s783_s27 = smov 95   ;;  %vm134_vm1 = vcmask 1031168  }
   0xc   :  { %v277_v48 = vld [vmem:[#allocation2 + $0x6] sm:$0x3f]  ;;  %v325_v52 = vld [vmem:[#allocation2] sm:$0x3f]  ;;  %s784_s28 = smov 94   ;;  %vm534_vm2 = vcmask 1041408  }
   0xd   :  { %v326_v56 = vld [vmem:[#allocation2 + $0x6] sm:$0x3f]  ;;  %v374_v60 = vld [vmem:[#allocation2] sm:$0x3f]  ;;  %vm547_vm3 = vcmask 1043456   ;;  %vm208_vm4 = vcmask 916480  }
   0xe   :  { %v819_v2 = vld.sshfl [vmem:[#allocation1] sm:$0xff pattern:$0x73625140]  ;;  %v821_v3 = vld.sshfl [vmem:[#allocation1 + $0x8] sm:$0xff pattern:$0x73625140] }
   0xf   :  { %46 = vst [vmem:[#allocation1] ss:$4 sm:$0xff] %v38_v1  ;;  %v375_v0 = vld [vmem:[#allocation2 + $0x6] sm:$0x3f]  ;;  %vm556_vm5 = vcmask 1045504   ;;  %vm257_vm6 = vcmask 908288  }
  0x10   :  { %vm292_vm7 = vcmask 900096   ;;  %vm341_vm8 = vcmask 785408   ;;  %vm425_vm9 = vcmask 769024   ;;  %vm390_vm10 = vcmask 777216   ;;  %s691_s9 = sshll.u32 %s1068_s4, 4  ;;  %s787_s10 = smov 256   ;;  %s692_s9 = int_to_ptr.hbm [resolvable:$true] %s691_s9 }
  0x11   :  { %vm608_vm11 = vcmask 293888   ;;  %s788_s11 = smov 16  }
  0x16   :  { %v826_v5 = vld.sshfl [vmem:[#allocation1] sm:$0xff pattern:$0x73625140]  ;;  %v828_v6 = vld.sshfl [vmem:[#allocation1 + $0x8] sm:$0xff pattern:$0x73625140] }
  0x17   :  { %52 = vst [vmem:[#allocation1] ss:$9 sm:$0xff] %v35_v4 }
  0x1e   :  { %v830_v8 = vld [vmem:[#allocation1] sm:$0xff]  ;;  %v832_v9 = vld [vmem:[#allocation1 + $0x9] sm:$0xff]  ;;  %v834_v10 = vld [vmem:[#allocation1 + $0x12] sm:$0xff] }
  0x1f   :  { %v836_v11 = vld [vmem:[#allocation1 + $0x1b] sm:$0xff] }
  0x20   :  { %86 = vst [vmem:[#allocation1] ss:$4 sm:$0xff] %v83_v7 }
  0x27   :  { %v838_v13 = vld.sshfl [vmem:[#allocation1] sm:$0xff pattern:$0x73625140]  ;;  %v840_v14 = vld.sshfl [vmem:[#allocation1 + $0x8] sm:$0xff pattern:$0x73625140] }
  0x28   :  { %v842_v15 = vld.sshfl [vmem:[#allocation1 + $0x10] sm:$0xff pattern:$0x73625140] }
  0x29   :  { %103 = vst [vmem:[#allocation1] ss:$4 sm:$0xff] %v84_v12 }
  0x30   :  { %v106_v17 = vld.sshfl [vmem:[#allocation1 + $0x8] sm:$0xff pattern:$0x73625140]  ;;  %v108_v18 = vld.sshfl [vmem:[#allocation1 + $0x10] sm:$0xff pattern:$0x73625140] }
  0x31   :  { %112 = vrot.lane.b32.xlu1 %v106_v17, %s778_s3  ;;  %v104_v19 = vld.sshfl [vmem:[#allocation1] sm:$0xff pattern:$0x73625140]  ;;  %114 = vrot.lane.b32.xlu2 %v108_v18, %s778_s3  ;;  %v66_v18 = vpack.i.b16 %v836_v11, %v836_v11 }
  0x32   :  { %110 = vrot.lane.b32.xlu0 %v104_v19, %s778_s3  ;;  %121 = vst [vmem:[#allocation1] ss:$4 sm:$0xff] %v118_v16  ;;  %v63_v19 = vpack.i.b16 %v834_v10, %v834_v10 }
  0x33   :  { %v68_v10 = vperm.slane %v66_v18, 0 }
  0x39   :  { %v124_v21 = vld.sshfl [vmem:[#allocation1 + $0x8] sm:$0xff pattern:$0x73625140]  ;;  %v126_v22 = vld.sshfl [vmem:[#allocation1 + $0x10] sm:$0xff pattern:$0x73625140] }
  0x3a   :  { %130 = vrot.lane.b32.xlu1 %v124_v21, %s779_s23  ;;  %v122_v23 = vld.sshfl [vmem:[#allocation1] sm:$0xff pattern:$0x73625140]  ;;  %132 = vrot.lane.b32.xlu2 %v126_v22, %s779_s23  ;;  %v409_v21 = vld [vmem:[#allocation2] sm:$0x3f] }
  0x3b   :  { %128 = vrot.lane.b32.xlu0 %v122_v23, %s779_s23  ;;  %140 = vst [vmem:[#allocation1] ss:$4 sm:$0xff] %v119_v20 }
  0x42   :  { %v141_v24 = vld.sshfl [vmem:[#allocation1] sm:$0xff pattern:$0x73625140]  ;;  %v143_v25 = vld.sshfl [vmem:[#allocation1 + $0x8] sm:$0xff pattern:$0x73625140] }
  0x43   :  { %v145_v26 = vld.sshfl [vmem:[#allocation1 + $0x10] sm:$0xff pattern:$0x73625140]  ;;  %149 = vrot.lane.b32.xlu1 %v143_v25, %s779_s23  ;;  %147 = vrot.lane.b32.xlu0 %v141_v24, %s779_s23 }
  0x44   :  { %157 = vst [vmem:[#allocation1] ss:$9 sm:$0xff] %v35_v4  ;;  %151 = vrot.lane.b32.xlu2 %v145_v26, %s779_s23 }
  0x4b   :  { %v847_v28 = vld [vmem:[#allocation1] sm:$0xff]  ;;  %v849_v29 = vld [vmem:[#allocation1 + $0x9] sm:$0xff]  ;;  %v851_v30 = vld [vmem:[#allocation1 + $0x12] sm:$0xff] }
  0x4c   :  { %v853_v31 = vld [vmem:[#allocation1 + $0x1b] sm:$0xff]  ;;  %v166_v16 = vshrl.u32 %v849_v29, 16  ;;  %v162_v17 = vshrl.u32 %v847_v28, 16  ;;  %v65_v28 = vperm.slane %v63_v19, 0 }
  0x4d   :  { %195 = vst [vmem:[#allocation1] ss:$4 sm:$0xff] %v192_v27 }
  0x4e   :  { %v167_v24 = vpack.i.b16 %v166_v16, %v166_v16  ;;  %v163_v29 = vpack.i.b16 %v162_v17, %v162_v17 }
  0x54   :  { %v198_v33 = vld.sshfl [vmem:[#allocation1 + $0x8] sm:$0xff pattern:$0x73625140]  ;;  %v196_v34 = vld.sshfl [vmem:[#allocation1] sm:$0xff pattern:$0x73625140] }
  0x55   :  { %204 = vrot.lane.b32.xlu1 %v198_v33, %s780_s24  ;;  %202 = vrot.lane.b32.xlu0 %v196_v34, %s780_s24  ;;  %v200_v35 = vld.sshfl [vmem:[#allocation1 + $0x10] sm:$0xff pattern:$0x73625140]  ;;  %v165_v34 = vperm.slane %v163_v29, 0 }
  0x56   :  { %214 = vst [vmem:[#allocation1] ss:$4 sm:$0xff] %v193_v32  ;;  %206 = vrot.lane.b32.xlu2 %v200_v35, %s780_s24  ;;  %v169_v32 = vperm.slane %v167_v24, 0  ;;  %v174_v35 = vshrl.u32 %v853_v31, 16 }
  0x58   :  { %v175_v31 = vpack.i.b16 %v174_v35, %v174_v35 }
  0x5d   :  { %v217_v37 = vld.sshfl [vmem:[#allocation1 + $0x8] sm:$0xff pattern:$0x73625140]  ;;  %v215_v38 = vld.sshfl [vmem:[#allocation1] sm:$0xff pattern:$0x73625140] }
  0x5e   :  { %223 = vrot.lane.b32.xlu1 %v217_v37, %s780_s24  ;;  %221 = vrot.lane.b32.xlu0 %v215_v38, %s780_s24  ;;  %v219_v39 = vld.sshfl [vmem:[#allocation1 + $0x10] sm:$0xff pattern:$0x73625140]  ;;  %v72_v37 = vunpack.c.l.bf16 %v828_v6  ;;  %v893_v38 = vunpack.c.l.bf16 %v68_v10 }
  0x5f   :  { %244 = vst [vmem:[#allocation1] ss:$4 sm:$0xff] %v241_v36  ;;  %225 = vrot.lane.b32.xlu2 %v219_v39, %s780_s24  ;;  %v170_v36 = vshrl.u32 %v851_v30, 16  ;;  %v71_v39 = vunpack.c.l.bf16 %v826_v5 }
  0x60   :  { %v80_v5 = vmul.f32 %v893_v38, %v72_v37 }
  0x61   :  { %v171_v30 = vpack.i.b16 %v170_v36, %v170_v36 }
  0x66   :  { %v245_v41 = vld.sshfl [vmem:[#allocation1] sm:$0xff pattern:$0x73625140]  ;;  %v855_v42 = vld.sshfl [vmem:[#allocation1 + $0x8] sm:$0xff pattern:$0x73625140] }
  0x67   :  { %251 = vrot.lane.b32.xlu0 %v245_v41, %s781_s25  ;;  %v858_v43 = vld.sshfl [vmem:[#allocation1 + $0x10] sm:$0xff pattern:$0x73625140] }
  0x68   :  { %261 = vst [vmem:[#allocation1] ss:$4 sm:$0xff] %v242_v40  ;;  %v896_v40 = vunpack.c.l.bf16 %v65_v28 }
  0x6f   :  { %v264_v45 = vld.sshfl [vmem:[#allocation1 + $0x8] sm:$0xff pattern:$0x73625140]  ;;  %v262_v46 = vld.sshfl [vmem:[#allocation1] sm:$0xff pattern:$0x73625140] }
  0x70   :  { %270 = vrot.lane.b32.xlu1 %v264_v45, %s781_s25  ;;  %268 = vrot.lane.b32.xlu0 %v262_v46, %s781_s25  ;;  %v266_v47 = vld.sshfl [vmem:[#allocation1 + $0x10] sm:$0xff pattern:$0x73625140] }
  0x71   :  { %279 = vst [vmem:[#allocation1] ss:$4 sm:$0xff] %v276_v44  ;;  %272 = vrot.lane.b32.xlu2 %v266_v47, %s781_s25  ;;  %v898_v44 = vunpack.c.l.bf16 %v169_v32  ;;  %v410_v45 = vld [vmem:[#allocation2 + $0x6] sm:$0x3f] }
  0x78   :  { %v282_v49 = vld.sshfl [vmem:[#allocation1 + $0x8] sm:$0xff pattern:$0x73625140]  ;;  %v280_v50 = vld.sshfl [vmem:[#allocation1] sm:$0xff pattern:$0x73625140] }
  0x79   :  { %288 = vrot.lane.b32.xlu1 %v282_v49, %s782_s26  ;;  %286 = vrot.lane.b32.xlu0 %v280_v50, %s782_s26  ;;  %v284_v51 = vld.sshfl [vmem:[#allocation1 + $0x10] sm:$0xff pattern:$0x73625140] }
  0x7a   :  { %298 = vst [vmem:[#allocation1] ss:$4 sm:$0xff] %v277_v48  ;;  %290 = vrot.lane.b32.xlu2 %v284_v51, %s782_s26  ;;  %v901_v48 = vunpack.c.l.bf16 %v165_v34 }
  0x81   :  { %v303_v53 = vld.sshfl [vmem:[#allocation1 + $0x10] sm:$0xff pattern:$0x73625140]  ;;  %v299_v54 = vld.sshfl [vmem:[#allocation1] sm:$0xff pattern:$0x73625140] }
  0x82   :  { %309 = vrot.lane.b32.xlu1 %v303_v53, %s782_s26  ;;  %305 = vrot.lane.b32.xlu0 %v299_v54, %s782_s26  ;;  %v301_v55 = vld.sshfl [vmem:[#allocation1 + $0x8] sm:$0xff pattern:$0x73625140] }
  0x83   :  { %328 = vst [vmem:[#allocation1] ss:$4 sm:$0xff] %v325_v52  ;;  %v79_v52 = vmul.f32 %v896_v40, %v71_v39 }
  0x8a   :  { %307 = vrot.lane.b32.xlu0 %v301_v55, %s782_s26  ;;  %v331_v57 = vld.sshfl [vmem:[#allocation1 + $0x8] sm:$0xff pattern:$0x73625140]  ;;  %v329_v58 = vld.sshfl [vmem:[#allocation1] sm:$0xff pattern:$0x73625140] }
  0x8b   :  { %337 = vrot.lane.b32.xlu1 %v331_v57, %s776_s20  ;;  %v333_v59 = vld.sshfl [vmem:[#allocation1 + $0x10] sm:$0xff pattern:$0x73625140]  ;;  %v115_v12 = vpop.permute.xlu2 %114  ;;  %v177_v57 = vperm.slane %v175_v31, 0 }
  0x8c   :  { %347 = vst [vmem:[#allocation1] ss:$4 sm:$0xff] %v326_v56  ;;  %339 = vrot.lane.b32.xlu2 %v333_v59, %s776_s20  ;;  %v82_v59 = vpack.c.bf16 %v80_v5, %v79_v52 }
  0x8e   :  { %v462_v18 = vunpack.c.l.b16 %v82_v59  ;;  %v463_v19 = vunpack.c.h.b16 %v82_v59 }
  0x90   :  { %v466_v10 = vpack.c.b16 %v462_v18, %v462_v18  ;;  %v467_v28 = vpack.c.b16 %v463_v19, %v463_v19 }
  0x92   :  { %335 = vrot.lane.b32.xlu0 %v329_v58, %s776_s20  ;;  %v173_v58 = vperm.slane %v171_v30, 0 }
  0x93   :  { %v350_v61 = vld.sshfl [vmem:[#allocation1 + $0x8] sm:$0xff pattern:$0x73625140]  ;;  %v348_v62 = vld.sshfl [vmem:[#allocation1] sm:$0xff pattern:$0x73625140] }
  0x94   :  { %356 = vrot.lane.b32.xlu1 %v350_v61, %s776_s20  ;;  %v352_v63 = vld.sshfl [vmem:[#allocation1 + $0x10] sm:$0xff pattern:$0x73625140]  ;;  %v133_v33 = vpop.permute.xlu2 %132 }
  0x95   :  { %358 = vrot.lane.b32.xlu2 %v352_v63, %s776_s20  ;;  %377 = vst [vmem:[#allocation1] ss:$4 sm:$0xff] %v374_v60  ;;  %v913_v63 = vunpack.c.l.bf16 %v177_v57 }
  0x9a   :  { %354 = vrot.lane.b32.xlu0 %v348_v62, %s776_s20 }
  0x9c   :  { %v869_v1 = vld.sshfl [vmem:[#allocation1] sm:$0xff pattern:$0x73625140]  ;;  %v871_v4 = vld.sshfl [vmem:[#allocation1 + $0x8] sm:$0xff pattern:$0x73625140] }
  0x9d   :  { %v873_v7 = vld.sshfl [vmem:[#allocation1 + $0x10] sm:$0xff pattern:$0x73625140] }
  0x9e   :  { %394 = vst [vmem:[#allocation1] ss:$4 sm:$0xff] %v375_v0  ;;  %v152_v61 = vpop.permute.xlu2 %151 }
  0xa3   :  { %v113_v20 = vpop.permute.xlu1 %112 }
  0xa4   :  { %v882_v22 = vsel %vm99_vm0, %v113_v20, %v115_v12  ;;  %v111_v23 = vpop.permute.xlu0 %110  ;;  %v915_v12 = vunpack.c.l.bf16 %v173_v58 }
  0xa5   :  { %v397_v25 = vld.sshfl [vmem:[#allocation1 + $0x8] sm:$0xff pattern:$0x73625140]  ;;  %v395_v26 = vld.sshfl [vmem:[#allocation1] sm:$0xff pattern:$0x73625140]  ;;  %v885_v27 = vsel %vm99_vm0, %v111_v23, %v113_v20 }
  0xa6   :  { %403 = vrot.lane.b32.xlu1 %v397_v25, %s783_s27  ;;  %401 = vrot.lane.b32.xlu0 %v395_v26, %s783_s27  ;;  %v399_v11 = vld.sshfl [vmem:[#allocation1 + $0x10] sm:$0xff pattern:$0x73625140]  ;;  %v471_v29 = vrot.slane %v882_v22, 6  ;;  %v60_v22 = vpack.i.b16 %v832_v9, %v832_v9 }
  0xa7   :  { %405 = vrot.lane.b32.xlu2 %v399_v11, %s783_s27  ;;  %412 = vst [vmem:[#allocation1] ss:$4 sm:$0xff] %v409_v21  ;;  %v470_v11 = vrot.slane %v885_v27, 6  ;;  %v57_v27 = vpack.i.b16 %v830_v8, %v830_v8 }
  0xa8   :  { %v546_v36 = vsel %vm534_vm2, %v467_v28, %v471_v29 }
  0xac   :  { %v131_v41 = vpop.permute.xlu1 %130 }
  0xad   :  { %v136_v46 = vsel %vm134_vm1, %v131_v41, %v133_v33  ;;  %v129_v47 = vpop.permute.xlu0 %128 }
  0xae   :  { %v415_v49 = vld.sshfl [vmem:[#allocation1 + $0x8] sm:$0xff pattern:$0x73625140]  ;;  %v413_v6 = vld.sshfl [vmem:[#allocation1] sm:$0xff pattern:$0x73625140]  ;;  %v179_v50 = vunpack.c.l.bf16 %v136_v46  ;;  %v135_v51 = vsel %vm134_vm1, %v129_v47, %v131_v41 }
  0xaf   :  { %421 = vrot.lane.b32.xlu1 %v415_v49, %s784_s28  ;;  %419 = vrot.lane.b32.xlu0 %v413_v6, %s784_s28  ;;  %v417_v53 = vld.sshfl [vmem:[#allocation1 + $0x10] sm:$0xff pattern:$0x73625140]  ;;  %v178_v54 = vunpack.c.l.bf16 %v135_v51  ;;  %v62_v46 = vperm.slane %v60_v22, 0  ;;  %v59_v47 = vperm.slane %v57_v27, 0 }
  0xb0   :  { %423 = vrot.lane.b32.xlu2 %v417_v53, %s784_s28  ;;  %431 = vst [vmem:[#allocation1] ss:$4 sm:$0xff] %v410_v45  ;;  %v187_v55 = vmul.f32 %v898_v44, %v179_v50 }
  0xb1   :  { %v186_v56 = vmul.f32 %v901_v48, %v178_v54  ;;  %v940_v31 = vunpack.c.l.bf16 %v62_v46  ;;  %v942_v8 = vunpack.c.l.bf16 %v59_v47 }
  0xb3   :  { %v911_v60 = vpack.c.bf16 %v187_v55, %v186_v56 }
  0xb5   :  { %v150_v62 = vpop.permute.xlu1 %149  ;;  %v148_v0 = vpop.permute.xlu0 %147 }
  0xb6   :  { %v154_v16 = vsel %vm134_vm1, %v150_v62, %v152_v61  ;;  %v153_v17 = vsel %vm134_vm1, %v148_v0, %v150_v62 }
  0xb7   :  { %v432_v20 = vld.sshfl [vmem:[#allocation1] sm:$0xff pattern:$0x73625140]  ;;  %v434_v21 = vld.sshfl [vmem:[#allocation1 + $0x8] sm:$0xff pattern:$0x73625140]  ;;  %v181_v23 = vunpack.c.l.bf16 %v154_v16  ;;  %v180_v24 = vunpack.c.l.bf16 %v153_v17  ;;  %384 = vrot.lane.b32.xlu0 %v869_v1, %s783_s27  ;;  %v543_v1 = vsel %vm534_vm2, %v466_v10, %v470_v11 }
  0xb8   :  { %438 = vrot.lane.b32.xlu1 %v432_v20, %s784_s28  ;;  %440 = vrot.lane.b32.xlu2 %v434_v21, %s784_s28  ;;  %v436_v33 = vld.sshfl [vmem:[#allocation1 + $0x10] sm:$0xff pattern:$0x73625140] }
  0xb9   :  { %v189_v25 = vmul.f32 %v913_v63, %v181_v23  ;;  %v188_v26 = vmul.f32 %v915_v12, %v180_v24 }
  0xbb   :  { %v191_v32 = vpack.c.bf16 %v189_v25, %v188_v26 }
  0xbd   :  { %v476_v34 = vunpack.c.l.b16 %v191_v32  ;;  %v477_v35 = vunpack.c.h.b16 %v191_v32 }
  0xbf   :  { %93 = vrot.lane.b32.xlu0 %v838_v13, %s778_s3  ;;  %v480_v37 = vpack.c.b16 %v476_v34, %v476_v34  ;;  %v481_v39 = vpack.c.b16 %v477_v35, %v477_v35  ;;  %v207_v13 = vpop.permute.xlu2 %206 }
  0xc0   :  { %253 = vrot.lane.b32.xlu1 %v855_v42, %s781_s25  ;;  %442 = vrot.lane.b32.xlu2 %v436_v33, %s784_s28 }
  0xc1   :  { %v553_v41 = vsel %vm547_vm3, %v543_v1, %v480_v37  ;;  %v555_v45 = vsel %vm547_vm3, %v546_v36, %v481_v39 }
  0xc7   :  { %v205_v9 = vpop.permute.xlu1 %204  ;;  %v203_v30 = vpop.permute.xlu0 %202 }
  0xc8   :  { %386 = vrot.lane.b32.xlu1 %v871_v4, %s783_s27  ;;  %v210_v42 = vsel %vm208_vm4, %v205_v9, %v207_v13  ;;  %v209_v49 = vsel %vm208_vm4, %v203_v30, %v205_v9  ;;  %255 = vrot.lane.b32.xlu2 %v858_v43, %s781_s25  ;;  %v226_v53 = vpop.permute.xlu2 %225 }
  0xc9   :  { %v232_v6 = vunpack.c.l.bf16 %v210_v42  ;;  %v231_v50 = vunpack.c.l.bf16 %v209_v49 }
  0xcb   :  { %v236_v51 = vmul.f32 %v232_v6, %v940_v31  ;;  %v235_v5 = vmul.f32 %v231_v50, %v942_v8 }
  0xcd   :  { %v952_v52 = vpack.c.bf16 %v236_v51, %v235_v5 }
  0xd0   :  { %95 = vrot.lane.b32.xlu1 %v840_v14, %s778_s3  ;;  %v224_v4 = vpop.permute.xlu1 %223  ;;  %v222_v54 = vpop.permute.xlu0 %221  ;;  %388 = vrot.lane.b32.xlu2 %v873_v7, %s783_s27 }
  0xd1   :  { %v228_v55 = vsel %vm208_vm4, %v224_v4, %v226_v53  ;;  %v227_v43 = vsel %vm208_vm4, %v222_v54, %v224_v4  ;;  %v273_v19 = vpop.permute.xlu2 %272 }
  0xd2   :  { %v234_v56 = vunpack.c.l.bf16 %v228_v55  ;;  %v233_v57 = vunpack.c.l.bf16 %v227_v43 }
  0xd4   :  { %v238_v58 = vmul.f32 %v234_v56, %v893_v38  ;;  %v237_v59 = vmul.f32 %v233_v57, %v896_v40 }
  0xd6   :  { %v240_v61 = vpack.c.bf16 %v238_v58, %v237_v59 }
  0xd8   :  { %97 = vrot.lane.b32.xlu2 %v842_v15, %s778_s3  ;;  %v486_v14 = vunpack.c.l.b16 %v240_v61  ;;  %v487_v62 = vunpack.c.h.b16 %v240_v61 }
  0xd9   :  { %v964_v0 = vpop.permute.xlu0 %251  ;;  %v291_v26 = vpop.permute.xlu2 %290 }
  0xda   :  { %v490_v16 = vpack.c.b16 %v486_v14, %v486_v14  ;;  %v491_v7 = vpack.c.b16 %v487_v62, %v487_v62 }
  0xdc   :  { %v494_v17 = vrot.slane %v490_v16, 2  ;;  %v495_v18 = vrot.slane %v491_v7, 2 }
  0xde   :  { %v967_v20 = vsel %vm556_vm5, %v553_v41, %v494_v17  ;;  %v970_v21 = vsel %vm556_vm5, %v555_v45, %v495_v18 }
  0xe2   :  { %v271_v23 = vpop.permute.xlu1 %270  ;;  %v269_v24 = vpop.permute.xlu0 %268 }
  0xe3   :  { %v973_v15 = vsel %vm257_vm6, %v271_v23, %v273_v19  ;;  %v976_v25 = vsel %vm257_vm6, %v269_v24, %v271_v23 }
  0xe6   :  { %v340_v11 = vpop.permute.xlu2 %339 }
  0xeb   :  { %v287_v29 = vpop.permute.xlu0 %286  ;;  %v289_v10 = vpop.permute.xlu1 %288 }
  0xec   :  { %v294_v42 = vsel %vm292_vm7, %v289_v10, %v291_v26  ;;  %v293_v50 = vsel %vm292_vm7, %v287_v29, %v289_v10 }
  0xed   :  { %v316_v43 = vunpack.c.l.bf16 %v294_v42  ;;  %v315_v58 = vunpack.c.l.bf16 %v293_v50 }
  0xef   :  { %v359_v32 = vpop.permute.xlu2 %358  ;;  %v320_v18 = vmul.f32 %v316_v43, %v898_v44  ;;  %v319_v24 = vmul.f32 %v315_v58, %v901_v48 }
  0xf4   :  { %v306_v28 = vpop.permute.xlu0 %305  ;;  %v310_v33 = vpop.permute.xlu1 %309 }
  0xfc   :  { %v308_v34 = vpop.permute.xlu0 %307 }
  0xfd   :  { %v338_v1 = vpop.permute.xlu1 %337  ;;  %v311_v45 = vsel %vm292_vm7, %v306_v28, %v308_v34  ;;  %v312_v46 = vsel %vm292_vm7, %v308_v34, %v310_v33 }
  0xfe   :  { %v317_v13 = vunpack.c.l.bf16 %v311_v45  ;;  %v318_v9 = vunpack.c.l.bf16 %v312_v46  ;;  %v343_v29 = vsel %vm341_vm8, %v338_v1, %v340_v11  ;;  %v323_v46 = vpack.c.bf16 %v320_v18, %v319_v24 }
 0x100   :  { %v321_v49 = vmul.f32 %v317_v13, %v915_v12  ;;  %v322_v6 = vmul.f32 %v318_v9, %v913_v63 }
 0x101   :  { %v978_v36 = vpop.permute.xlu2 %405 }
 0x102   :  { %v324_v59 = vpack.c.bf16 %v322_v6, %v321_v49  ;;  %v785_v49 = vmov 0  }
 0x103   :  { %722 = vset.pattern.permute.xlu0 %v785_v49 }
 0x104   :  { %v336_v35 = vpop.permute.xlu0 %335  ;;  %v500_v26 = vunpack.c.l.b16 %v324_v59  ;;  %v501_v28 = vunpack.c.h.b16 %v324_v59 }
 0x105   :  { %v342_v7 = vsel %vm341_vm8, %v336_v35, %v338_v1 }
 0x106   :  { %v357_v27 = vpop.permute.xlu1 %356  ;;  %v504_v13 = vpack.c.b16 %v500_v26, %v500_v26  ;;  %v505_v11 = vpack.c.b16 %v501_v28, %v501_v28 }
 0x107   :  { %v361_v51 = vsel %vm341_vm8, %v357_v27, %v359_v32  ;;  %v364_v32 = vunpack.c.l.bf16 %v342_v7 }
 0x108   :  { %v367_v61 = vunpack.c.l.bf16 %v361_v51 }
 0x109   :  { %v368_v1 = vmul.f32 %v364_v32, %v942_v8 }
 0x10a   :  { %v424_v37 = vpop.permute.xlu2 %423  ;;  %v371_v10 = vmul.f32 %v367_v61, %v893_v38  ;;  %v602_v38 = vld [vmem:[%s1066_s2] sm:$0xff] }
 0x10b   :  { %605 = vperm.xlu0 %722, %v602_v38  }
 0x10c   :  { %v355_v22 = vpop.permute.xlu0 %354 }
 0x10d   :  { %v360_v30 = vsel %vm341_vm8, %v355_v22, %v357_v27 }
 0x10e   :  { %v366_v4 = vunpack.c.l.bf16 %v360_v30 }
 0x110   :  { %v370_v17 = vmul.f32 %v366_v4, %v896_v40  ;;  %v365_v40 = vunpack.c.l.bf16 %v343_v29 }
 0x112   :  { %v441_v47 = vpop.permute.xlu2 %440  ;;  %v373_v22 = vpack.c.bf16 %v371_v10, %v370_v17 }
 0x114   :  { %v514_v51 = vunpack.c.l.b16 %v373_v22  ;;  %v515_v4 = vunpack.c.h.b16 %v373_v22 }
 0x116   :  { %v518_v61 = vpack.c.b16 %v514_v51, %v514_v51 }
 0x118   :  { %v980_v39 = vpop.permute.xlu1 %403  ;;  %v982_v41 = vpop.permute.xlu0 %401 }
 0x11a   :  { %v443_v14 = vpop.permute.xlu2 %442 }
 0x11b   :  { %v445_v19 = vsel %vm425_vm9, %v441_v47, %v443_v14 }
 0x11c   :  { %v451_v35 = vunpack.c.l.bf16 %v445_v19 }
 0x11e   :  { %v455_v6 = vmul.f32 %v451_v35, %v913_v63  ;;  %v407_v63 = vsel %vm390_vm10, %v982_v41, %v980_v39 }
 0x121   :  { %v422_v5 = vpop.permute.xlu1 %421  ;;  %v420_v53 = vpop.permute.xlu0 %419 }
 0x122   :  { %v427_v54 = vsel %vm425_vm9, %v422_v5, %v424_v37  ;;  %v426_v55 = vsel %vm425_vm9, %v420_v53, %v422_v5  ;;  %v256_v9 = vpop.permute.xlu2 %255  ;;  %v69_v5 = vunpack.c.l.bf16 %v819_v2  ;;  %v369_v53 = vmul.f32 %v365_v40, %v940_v31 }
 0x123   :  { %v449_v56 = vunpack.c.l.bf16 %v427_v54  ;;  %v448_v57 = vunpack.c.l.bf16 %v426_v55  ;;  %v498_v54 = vunpack.c.l.b16 %v323_v46  ;;  %v499_v55 = vunpack.c.h.b16 %v323_v46 }
 0x124   :  { %v77_v14 = vmul.f32 %v942_v8, %v69_v5  ;;  %v601_v5 = vld [vmem:[%s1065_s1] sm:$0xf]  ;;  %s786_s1 = smov [#allocation5]  }
 0x125   :  { %v453_v62 = vmul.f32 %v449_v56, %v898_v44  ;;  %v452_v16 = vmul.f32 %v448_v57, %v901_v48  ;;  %v508_v56 = vrot.slane %v504_v13, 6  ;;  %v509_v57 = vrot.slane %v505_v11, 6  ;;  %s689_s6 = sshll.u32 %s786_s1, 4  ;;  %s690_s6 = int_to_ptr.vmem [resolvable:$true] %s689_s6 }
 0x126   :  { %v502_v7 = vpack.c.b16 %v498_v54, %v498_v54  ;;  %v503_v17 = vpack.c.b16 %v499_v55, %v499_v55 }
 0x127   :  { %v456_v23 = vpack.c.bf16 %v453_v62, %v452_v16  ;;  %v408_v62 = vsel %vm390_vm10, %v980_v39, %v978_v36  ;;  %v519_v16 = vpack.c.b16 %v515_v4, %v515_v4  ;;  %v577_v41 = vsel %vm534_vm2, %v976_v25, %v508_v56 }
 0x128   :  { %v580_v24 = vsel %vm534_vm2, %v973_v15, %v509_v57  ;;  %v586_v39 = vsel %vm547_vm3, %v577_v41, %v518_v61 }
 0x129   :  { %v526_v33 = vunpack.c.l.b16 %v456_v23  ;;  %v527_v34 = vunpack.c.h.b16 %v456_v23  ;;  %v522_v23 = vrot.slane %v407_v63, 2  ;;  %v385_v10 = vpop.permute.xlu0 %384  ;;  %v588_v25 = vsel %vm547_vm3, %v580_v24, %v519_v16 }
 0x12a   :  { %v439_v27 = vpop.permute.xlu1 %438  ;;  %v389_v36 = vpop.permute.xlu2 %388 }
 0x12b   :  { %v444_v44 = vsel %vm425_vm9, %v439_v27, %v441_v47  ;;  %v530_v37 = vpack.c.b16 %v526_v33, %v526_v33  ;;  %v531_v45 = vpack.c.b16 %v527_v34, %v527_v34  ;;  %v70_v47 = vunpack.c.l.bf16 %v821_v3 }
 0x12c   :  { %v450_v48 = vunpack.c.l.bf16 %v444_v44  ;;  %v372_v3 = vpack.c.bf16 %v369_v53, %v368_v1  ;;  %v506_v33 = vrot.slane %v502_v7, 6  ;;  %v507_v34 = vrot.slane %v503_v17, 6 }
 0x12d   :  { %v613_v30 = vsel %vm534_vm2, %v530_v37, 0  ;;  %v616_v42 = vsel %vm534_vm2, %v531_v45, 0  ;;  %v78_v2 = vmul.f32 %v940_v31, %v70_v47  ;;  %v523_v31 = vrot.slane %v408_v62, 2 }
 0x12e   :  { %v454_v50 = vmul.f32 %v450_v48, %v915_v12  ;;  %629 = vmatpush.bf16.msra.mxu0 %v613_v30  ;;  %642 = vmatpush.bf16.msra.mxu1 %v616_v42  ;;  %v512_v26 = vunpack.c.l.b16 %v372_v3  ;;  %v513_v15 = vunpack.c.h.b16 %v372_v3  ;;  %v596_v22 = vsel %vm556_vm5, %v586_v39, %v522_v23 }
 0x12f   :  { %v599_v37 = vsel %vm556_vm5, %v588_v25, %v523_v31  ;;  %v484_v1 = vunpack.c.l.b16 %v952_v52  ;;  %v485_v30 = vunpack.c.h.b16 %v952_v52  ;;  %v474_v52 = vunpack.c.l.b16 %v911_v60 }
 0x130   :  { %v457_v43 = vpack.c.bf16 %v455_v6, %v454_v50  ;;  %v516_v35 = vpack.c.b16 %v512_v26, %v512_v26  ;;  %v517_v13 = vpack.c.b16 %v513_v15, %v513_v15  ;;  %v475_v53 = vunpack.c.h.b16 %v911_v60 }
 0x131   :  { %v94_v50 = vpop.permute.xlu0 %93  ;;  %v488_v55 = vpack.c.b16 %v484_v1, %v484_v1  ;;  %v489_v56 = vpack.c.b16 %v485_v30, %v485_v30  ;;  %v478_v63 = vpack.c.b16 %v474_v52, %v474_v52 }
 0x132   :  { %v254_v12 = vpop.permute.xlu1 %253  ;;  %v528_v58 = vunpack.c.l.b16 %v457_v43  ;;  %v529_v59 = vunpack.c.h.b16 %v457_v43  ;;  %v98_v51 = vpop.permute.xlu2 %97 }
 0x133   :  { %v258_v28 = vsel %vm257_vm6, %v964_v0, %v254_v12  ;;  %v259_v32 = vsel %vm257_vm6, %v254_v12, %v256_v9  ;;  %v81_v0 = vpack.c.bf16 %v78_v2, %v77_v14  ;;  %v479_v12 = vpack.c.b16 %v475_v53, %v475_v53 }
 0x134   :  { %v532_v18 = vpack.c.b16 %v528_v58, %v528_v58  ;;  %v533_v19 = vpack.c.b16 %v529_v59, %v529_v59  ;;  %v571_v27 = vsel %vm534_vm2, %v258_v28, %v506_v33  ;;  %v574_v40 = vsel %vm534_vm2, %v259_v32, %v507_v34 }
 0x135   :  { %v582_v38 = vsel %vm547_vm3, %v571_v27, %v516_v35  ;;  %v584_v11 = vsel %vm547_vm3, %v574_v40, %v517_v13  ;;  %v460_v47 = vunpack.c.l.b16 %v81_v0  ;;  %v461_v6 = vunpack.c.h.b16 %v81_v0 }
 0x136   :  { %v619_v8 = vsel %vm534_vm2, %v532_v18, 0  ;;  %v622_v29 = vsel %vm534_vm2, %v533_v19, 0  ;;  %v492_v58 = vrot.slane %v488_v55, 2  ;;  %v493_v59 = vrot.slane %v489_v56, 2 }
 0x137   :  { %655 = vmatpush.bf16.msra.mxu2 %v619_v8  ;;  %668 = vmatpush.bf16.msra.mxu3 %v622_v29  ;;  %v464_v54 = vpack.c.b16 %v460_v47, %v460_v47  ;;  %v465_v43 = vpack.c.b16 %v461_v6, %v461_v6 }
 0x13a   :  { %v387_v44 = vpop.permute.xlu1 %386 }
 0x13b   :  { %v391_v45 = vsel %vm390_vm10, %v385_v10, %v387_v44  ;;  %v392_v46 = vsel %vm390_vm10, %v387_v44, %v389_v36  ;;  %656 = vmatpush.bf16.msra.mxu2 %v596_v22  ;;  %669 = vmatpush.bf16.msra.mxu3 %v599_v37 }
 0x13c   :  { %v520_v48 = vrot.slane %v391_v45, 2  ;;  %v521_v9 = vrot.slane %v392_v46, 2 }
 0x13e   :  { %v590_v42 = vsel %vm556_vm5, %v582_v38, %v520_v48  ;;  %v593_v49 = vsel %vm556_vm5, %v584_v11, %v521_v9 }
 0x13f   :  { %630 = vmatpush.bf16.msra.mxu0 %v590_v42  ;;  %643 = vmatpush.bf16.msra.mxu1 %v593_v49 }
 0x140   :  { %657 = vmatpush.bf16.msra.mxu2 %v967_v20  ;;  %670 = vmatpush.bf16.msra.mxu3 %v970_v21 }
 0x142   :  { %v96_v4 = vpop.permute.xlu1 %95 }
 0x143   :  { %706 = vmatmul.msk.bf16.vlgmr.msra.gmra.mxu2 %vm608_vm11, %v601_v5  ;;  %707 = vmatmul.msk.bf16.vlgmr.msra.gmra.mxu3 %vm608_vm11, %v601_v5  ;;  %v100_v20 = vsel %vm99_vm0, %v94_v50, %v96_v4  ;;  %v101_v21 = vsel %vm99_vm0, %v96_v4, %v98_v51 }
 0x144   :  { %v468_v57 = vrot.slane %v100_v20, 6  ;;  %v469_v3 = vrot.slane %v101_v21, 6 }
 0x146   :  { %v537_v60 = vsel %vm534_vm2, %v464_v54, %v468_v57  ;;  %v540_v61 = vsel %vm534_vm2, %v465_v43, %v469_v3 }
 0x147   :  { %v549_v2 = vsel %vm547_vm3, %v537_v60, %v478_v63  ;;  %v551_v14 = vsel %vm547_vm3, %v540_v61, %v479_v12 }
 0x148   :  { %v558_v62 = vsel %vm556_vm5, %v549_v2, %v492_v58  ;;  %v561_v16 = vsel %vm556_vm5, %v551_v14, %v493_v59 }
 0x149   :  { %631 = vmatpush.bf16.msra.mxu0 %v558_v62  ;;  %644 = vmatpush.bf16.msra.mxu1 %v561_v16 }
 0x14c   :  { %704 = vmatmul.msk.bf16.vlgmr.msra.gmra.mxu0 %vm608_vm11, %v601_v5  ;;  %705 = vmatmul.msk.bf16.vlgmr.msra.gmra.mxu1 %vm608_vm11, %v601_v5 }
 0x17d   :  { %v606_v7 = vpop.permute.xlu0 %605 }
 0x1c6   :  { %v659_v17 = vpop.f32.mrf.mxu2  ;;  %v672_v18 = vpop.f32.mrf.mxu3 }
 0x1c7   :  { %v660_v19 = vadd.f32 %v659_v17, %v606_v7  ;;  %v673_v23 = vadd.f32 %v672_v18, %v606_v7 }
 0x1c9   :  { %v678_v41 = vmax.f32 %v660_v19, 0.0  ;;  %v679_v24 = vmax.f32 %v673_v23, 0.0  ;;  %v633_v26 = vpop.f32.mrf.mxu0  ;;  %v646_v31 = vpop.f32.mrf.mxu1 }
 0x1ca   :  { %v634_v8 = vadd.f32 %v633_v26, %v606_v7  ;;  %v647_v29 = vadd.f32 %v646_v31, %v606_v7 }
 0x1cb   :  { %683 = vst [vmem:[#allocation5 + $0x10] sm:$0xff] %v678_v41 }
 0x1cc   :  { %684 = vst [vmem:[#allocation5 + $0x18] sm:$0xff] %v679_v24  ;;  %v676_v10 = vmax.f32 %v634_v8, 0.0  ;;  %v677_v36 = vmax.f32 %v647_v29, 0.0 }
 0x1ce   :  { %680 = vst [vmem:[#allocation5] sm:$0xff] %v676_v10  ;;  %v661_v39 = vpop.f32.mrf.mxu2  ;;  %v674_v28 = vpop.f32.mrf.mxu3 }
 0x1cf   :  { %681 = vst [vmem:[#allocation5 + $0x8] sm:$0xff] %v677_v36 }
 0x1d0   :  { %697 = dma.vmem_to_hbm [thread:$0]  %s690_s6, 512, %s692_s9, [#allocation4], %s787_s10, %s787_s10, %s788_s11  }
 0x1d1   :  { %v635_v32 = vpop.f32.mrf.mxu0  ;;  %v648_v25 = vpop.f32.mrf.mxu1 }
 0x1d2   :  { %773 = dma.done.wait [#allocation4], 512  }
 0x1d3   :  { %774 = vsyncadd [#allocation4], 4294966784 }
 0x1d4   :  { %702 = vsyncpa [#allocation3], 1 }
 0x1d5   :  { %703 = vsyncpa [#allocation4], 1 }

</bundles_post_ra>
